<compile_context>
chip_gen: v6e
topology: v6e:2x2x1
jax: 0.10.0
libtpu: 0.0.40
codegen_flags: <defaults>
</compile_context>

<pallas_src>
import functools

import jax
import jax.numpy as jnp
from jax.experimental import pallas as pl
from jax.experimental.pallas import tpu as pltpu

EMBED_DIM = 768          # self.embedding_dim
IN_PLANES = 2048         # self.in_planes
NUM_CLASSES = 20         # VOC
CPAD = 128               # class axis zero-padded to a full lane tile
FEAT_HW = 14             # 14*14 = 196 spatial positions (fc_transform expects 196)
P_TOKENS = FEAT_HW * FEAT_HW
P_PAD = 256              # spatial/token axis padded to a tile-aligned MXU depth
PATCH = 4
IMG = FEAT_HW * PATCH    # 56x56 stand-in input image
N1_CHUNK = 512           # chunk width for the 2048-wide relu intermediate


def _round_up(x, m):
    return (x + m - 1) // m * m


def _cdiv(a, b):
    return -(-a // b)


# ----------------------------- Pallas kernels ------------------------------

def _backbone_fc_kernel(pf_ref, wres_ref, bres_ref, wfc_ref, bfc_ref, o_ref):
    """relu(pf @ W_res + b_res) @ W_fc_pad + b_fc_pad -> (tm, 128) bf16.

    The 2048-wide relu intermediate is produced in N1_CHUNK-wide pieces and the
    second matmul is accumulated chunk-by-chunk into an f32 accumulator, so the
    full (tm, 2048) f32 activation is never materialized / stored to VMEM.
    """
    pf = pf_ref[...]                                       # (tm, K) bf16
    acc = jnp.zeros(o_ref.shape, jnp.float32)
    for c in range(IN_PLANES // N1_CHUNK):                 # 4 chunks, unrolled
        w1 = wres_ref[:, pl.ds(c * N1_CHUNK, N1_CHUNK)]
        b1 = bres_ref[:, pl.ds(c * N1_CHUNK, N1_CHUNK)]
        x = jnp.dot(pf, w1, preferred_element_type=jnp.float32)
        x = jnp.maximum(x + b1, 0.0)                       # f32 relu epilogue
        w2 = wfc_ref[pl.ds(c * N1_CHUNK, N1_CHUNK), :]
        acc = acc + jnp.dot(x.astype(jnp.bfloat16), w2,
                            preferred_element_type=jnp.float32)
    o_ref[...] = (acc + bfc_ref[...]).astype(o_ref.dtype)


def _head_kernel(mask_ref, wftT_ref, bftT_ref, wvitT_ref, bvitT_ref,
                 wlastT_ref, blastT_ref, emaskT_ref,
                 semcls1_ref, semclsf_ref, *, rows_per_step):
    """Fused head over `rows_per_step` batch rows, feature-major.

    The class axis of each batch row rides on a full 128-lane tile; packing
    R=2 rows side-by-side gives a 256-lane MXU operand (v6e/v7x width).
    """
    m = mask_ref[...]                                      # (R, P_PAD, 128) bf16
    if rows_per_step == 1:
        packed = m[0]                                      # (P_PAD, 128)
    else:
        packed = jnp.concatenate(
            [m[r] for r in range(rows_per_step)], axis=-1)  # (P_PAD, R*128)

    # fc_transform, contracting the (padded) spatial axis feature-major:
    # sem_token^T = W_ft^T @ mask  (no HBM transpose of the class-sliced mask).
    stT = jnp.dot(wftT_ref[...], packed,
                  preferred_element_type=jnp.float32) + bftT_ref[...]   # (768, R*128)

    # GAP1d (AdaptiveAvgPool1d(1) over the 768-dim embedding axis) -> lane-dense.
    semcls1_ref[...] = jnp.mean(stT, axis=0, keepdims=True)[None]

    # ViT stand-in: per-token linear applied only to the semantic tokens that
    # the downstream slice actually consumes.
    # TODO(synk): external ViT encoder replaced by a per-token linear stand-in;
    # a real attention ViT mixes tokens and would need all 1+196+2C tokens.
    vitT = jnp.dot(wvitT_ref[...], stT.astype(jnp.bfloat16),
                   preferred_element_type=jnp.float32) + bvitT_ref[...]  # (768, R*128)

    # last_linear + (sem_cls_final * embed_mask).sum(-1)
    # (cosine-similarity matrix is symmetric, so emask == emask^T here).
    lastT = jnp.dot(wlastT_ref[...], vitT.astype(jnp.bfloat16),
                    preferred_element_type=jnp.float32) + blastT_ref[...]  # (128, R*128)
    semclsf_ref[...] = jnp.sum(lastT * emaskT_ref[...], axis=0, keepdims=True)[None]


def _cls_head_kernel(cls_ref, wvit_ref, bvit_ref, wvc_ref, bvc_ref, o_ref):
    """cls-token -> ViT stand-in -> vit_classifier, lane-dense (1, 128).

    Input/batch-independent under the stand-in, so run once at init.
    """
    xv = jnp.dot(cls_ref[...], wvit_ref[...],
                 preferred_element_type=jnp.float32) + bvit_ref[...]     # (1, 768)
    o_ref[...] = (jnp.dot(xv.astype(jnp.bfloat16), wvc_ref[...],
                          preferred_element_type=jnp.float32)
                  + bvc_ref[...]).astype(o_ref.dtype)                    # (1, 128)


def _cosine_kernel(e_ref, o_ref):
    # embed_mask[i, j] = cos(E[i], E[j])  (torch.cosine_similarity semantics:
    # each norm is clamped to eps before dividing).
    e = e_ref[...]                                                   # (C, D) f32
    g = jax.lax.dot_general(e, e, (((1,), (1,)), ((), ())),
                            preferred_element_type=jnp.float32)      # E @ E^T
    n = jnp.maximum(jnp.sqrt(jnp.sum(e * e, axis=-1, keepdims=True)), 1e-8)
    outer = jax.lax.dot_general(n, n, (((1,), (1,)), ((), ())),
                                preferred_element_type=jnp.float32)  # n_i * n_j
    o_ref[...] = g / outer


# ----------------------------- Pallas wrappers ------------------------------

def backbone_fc(pf, w_res, b_res, w_fc_pad, b_fc_pad):
    """(M, 48) patches -> (M, 128) padded class activations, fused."""
    M, K = pf.shape
    # Always >= 2 M-tiles: keeps both v7x TensorCores busy and enables
    # double-buffering of the pf tile; tiles capped around 256 rows.
    n_tiles = max(2, _cdiv(M, 256))
    tm = _round_up(_cdiv(M, n_tiles), 8)
    Mp = tm * n_tiles
    if Mp != M:
        pf = jnp.pad(pf, ((0, Mp - M), (0, 0)))
    N1 = w_res.shape[1]
    N2 = w_fc_pad.shape[1]
    out = pl.pallas_call(
        _backbone_fc_kernel,
        out_shape=jax.ShapeDtypeStruct((Mp, N2), jnp.bfloat16),
        grid=(n_tiles,),
        in_specs=[
            pl.BlockSpec((tm, K), lambda i: (i, 0)),
            pl.BlockSpec((K, N1), lambda i: (0, 0)),
            pl.BlockSpec((1, N1), lambda i: (0, 0)),
            pl.BlockSpec((N1, N2), lambda i: (0, 0)),
            pl.BlockSpec((1, N2), lambda i: (0, 0)),
        ],
        out_specs=pl.BlockSpec((tm, N2), lambda i: (i, 0)),
        compiler_params=pltpu.CompilerParams(
            dimension_semantics=("parallel",)),   # M tiles independent
    )(pf.astype(jnp.bfloat16),
      w_res.astype(jnp.bfloat16), b_res.reshape(1, N1).astype(jnp.float32),
      w_fc_pad.astype(jnp.bfloat16), b_fc_pad.reshape(1, N2).astype(jnp.float32))
    return out[:M]


def head(mask3, w_ftT_pad, b_ft, w_vitT, b_vit, w_lastT, b_last, emask_pad):
    """Fused semantic / ViT / last_linear head; packs 2 batch rows per step
    (256-lane MXU operands) when that still leaves >= 2 grid steps."""
    B, P, CP = mask3.shape
    D = EMBED_DIM
    bf = jnp.bfloat16

    R = 2 if (B % 2 == 0 and B >= 4) else 1     # rows per grid step
    NB = B // R
    NL = R * CP                                  # packed lane width (lane-dense)

    emask_t = (jnp.concatenate([emask_pad] * R, axis=1) if R > 1 else emask_pad)

    def full(shape):
        return pl.BlockSpec(shape, lambda b: (0, 0))

    out_shapes = (
        jax.ShapeDtypeStruct((NB, 1, NL), jnp.float32),   # sem_cls1 (packed)
        jax.ShapeDtypeStruct((NB, 1, NL), jnp.float32),   # sem_cls_final (packed)
    )
    return pl.pallas_call(
        functools.partial(_head_kernel, rows_per_step=R),
        out_shape=out_shapes,
        grid=(NB,),
        in_specs=[
            pl.BlockSpec((R, P, CP), lambda b: (b, 0, 0)),
            full((D, P)), full((D, 1)),
            full((D, D)), full((D, 1)),
            full((CP, D)), full((CP, 1)),
            full((CP, NL)),
        ],
        out_specs=(
            pl.BlockSpec((1, 1, NL), lambda b: (b, 0, 0)),
            pl.BlockSpec((1, 1, NL), lambda b: (b, 0, 0)),
        ),
        compiler_params=pltpu.CompilerParams(
            dimension_semantics=("parallel",)),   # batch groups independent
    )(mask3.astype(bf),
      w_ftT_pad.astype(bf), b_ft.reshape(D, 1).astype(jnp.float32),
      w_vitT.astype(bf), b_vit.reshape(D, 1).astype(jnp.float32),
      w_lastT.astype(bf), b_last.reshape(CP, 1).astype(jnp.float32),
      emask_t.astype(jnp.float32))


def pallas_cls_head(cls_tok, w_vit, b_vit, w_vc_pad, b_vc_pad):
    """Batch-invariant cls-token branch, computed once at init (lane-dense)."""
    D, CP = EMBED_DIM, CPAD
    return pl.pallas_call(
        _cls_head_kernel,
        out_shape=jax.ShapeDtypeStruct((1, CP), jnp.float32),
        grid=(1,),
        in_specs=[pl.BlockSpec((1, D), lambda i: (0, 0)),
                  pl.BlockSpec((D, D), lambda i: (0, 0)),
                  pl.BlockSpec((1, D), lambda i: (0, 0)),
                  pl.BlockSpec((D, CP), lambda i: (0, 0)),
                  pl.BlockSpec((1, CP), lambda i: (0, 0))],
        out_specs=pl.BlockSpec((1, CP), lambda i: (0, 0)),
    )(cls_tok.reshape(1, D).astype(jnp.bfloat16),
      w_vit.astype(jnp.bfloat16), b_vit.reshape(1, D).astype(jnp.float32),
      w_vc_pad.astype(jnp.bfloat16), b_vc_pad.reshape(1, CP).astype(jnp.float32))


def pallas_cosine_mask(E):
    """E: (C, D) -> (C, C) pairwise cosine similarity (run once at init)."""
    C, D = E.shape
    return pl.pallas_call(
        _cosine_kernel,
        out_shape=jax.ShapeDtypeStruct((C, C), jnp.float32),
        grid=(1,),
        in_specs=[pl.BlockSpec((C, D), lambda i: (0, 0))],
        out_specs=pl.BlockSpec((C, C), lambda i: (0, 0)),
    )(E.astype(jnp.float32))


# ------------------------------- glue (JAX) ---------------------------------

def patchify(x, patch):
    """NCHW (B, Cin, H, W) -> (B, (H/p)*(W/p), Cin*p*p)."""
    B, Cin, H, W = x.shape
    x = x.reshape(B, Cin, H // patch, patch, W // patch, patch)
    x = x.transpose(0, 2, 4, 1, 3, 5)
    return x.reshape(B, (H // patch) * (W // patch), Cin * patch * patch)


def init_params(key):
    ks = jax.random.split(key, 10)
    s = 0.02
    C, CP, D, K = NUM_CLASSES, CPAD, EMBED_DIM, 3 * PATCH * PATCH

    def pad_head(w, b):   # zero-pad an (in, C) class head to 128 output lanes
        return (jnp.pad(w, ((0, 0), (0, CP - w.shape[1]))),
                jnp.pad(b, (0, CP - b.shape[0])))

    # ResNet backbone stand-in (patch projection -> 2048 channels)
    # TODO(synk): external ResNet-50 `model` replaced by a deterministic patch-projection stand-in.
    w_res = jax.random.normal(ks[0], (K, IN_PLANES), jnp.float32) * s
    b_res = jnp.zeros((IN_PLANES,), jnp.float32)
    # self.fc : Conv2d(2048, num_classes, 1x1), padded to 128 output lanes
    w_fc, b_fc = pad_head(jax.random.normal(ks[1], (IN_PLANES, C), jnp.float32) * s,
                          jnp.zeros((C,), jnp.float32))
    # self.fc_transform : Linear(196, 768); consumed pre-transposed and padded
    # along the spatial axis to 256 for tile-aligned MXU contraction.
    w_ft = jax.random.normal(ks[2], (P_TOKENS, D), jnp.float32) * s
    b_ft = jnp.zeros((D,), jnp.float32)
    w_ftT_pad = jnp.pad(w_ft.T, ((0, 0), (0, P_PAD - P_TOKENS)))       # (768, 256)
    # ViT stand-in (per-token mixing linear)
    # TODO(synk): external ViT encoder replaced by a per-token linear stand-in.
    cls_tok = jax.random.normal(ks[4], (1, D), jnp.float32) * s
    w_vit = jax.random.normal(ks[5], (D, D), jnp.float32) * s
    b_vit = jnp.zeros((D,), jnp.float32)
    # self.vit_classifier : Linear(768, num_classes)  (padded)
    w_vc, b_vc = pad_head(jax.random.normal(ks[6], (D, C), jnp.float32) * s,
                          jnp.zeros((C,), jnp.float32))
    # self.last_linear : Linear(768, num_classes)     (padded, pre-transposed)
    w_last, b_last = pad_head(jax.random.normal(ks[7], (D, C), jnp.float32) * s,
                              jnp.zeros((C,), jnp.float32))
    # self.sem_embedding (BERT word embeddings)
    # TODO(synk): BERT label embeddings (./Bert/voc_embeddings.pt) replaced by deterministic random init.
    sem_embedding = jax.random.normal(ks[8], (1, C, D), jnp.float32)

    # embed_mask depends only on parameters -> computed once here (Pallas cosine
    # kernel) and padded to 128 lanes.
    embed_mask = pallas_cosine_mask(sem_embedding[0])                  # (C, C)
    embed_mask_pad = jnp.pad(embed_mask, ((0, CP - C), (0, CP - C)))   # (128, 128)

    # The cls-token / vit_classifier branch is input- and batch-independent under
    # the per-token ViT stand-in -> hoisted out of the per-batch head kernel and
    # computed once here (lane-dense).
    vit_cls_pad = pallas_cls_head(cls_tok, w_vit, b_vit, w_vc, b_vc)   # (1, 128)

    return {
        "w_res": w_res, "b_res": b_res,
        "w_fc_pad": w_fc, "b_fc_pad": b_fc,
        "w_ftT_pad": w_ftT_pad, "b_ft": b_ft,
        "w_vitT": w_vit.T, "b_vit": b_vit,
        "w_lastT": w_last.T, "b_last": b_last,
        "sem_embedding": sem_embedding,
        "embed_mask_pad": embed_mask_pad,
        "vit_cls_pad": vit_cls_pad,
    }


def m3tr_forward(params, x):
    B = x.shape[0]
    C = NUM_CLASSES
    P = P_TOKENS

    # ---- forward_feature (ResNet stand-in) + self.fc, fused in one kernel ----
    pf = patchify(x, PATCH).reshape(B * P, -1)                        # (B*196, 48)
    mask = backbone_fc(pf, params["w_res"], params["b_res"],
                       params["w_fc_pad"], params["b_fc_pad"])        # (B*196, 128) bf16

    # (B*P, 128) -> (B, P, 128): contiguous row-major reshape, no HBM transpose;
    # pad the spatial/token axis 196 -> 256 (zero rows; matching w_ftT columns
    # are zero) so the fc_transform contraction is tile-aligned on the MXU.
    mask3 = mask.reshape(B, P, CPAD)
    mask3 = jnp.pad(mask3, ((0, 0), (0, P_PAD - P), (0, 0)))

    # ---- fc_transform + GAP1d + ViT stand-in + last_linear
    #      + (sem_cls_final * embed_mask).sum(-1), fused per batch group ----
    sem_cls1_p, sem_cls_final_p = head(
        mask3, params["w_ftT_pad"], params["b_ft"],
        params["w_vitT"], params["b_vit"],
        params["w_lastT"], params["b_last"],
        params["embed_mask_pad"])

    # Unpack the R-packed lane tiles back to per-batch rows (row-major reshape).
    sem_cls1 = sem_cls1_p.reshape(B, CPAD)[:, :C]
    sem_cls_final = sem_cls_final_p.reshape(B, CPAD)[:, :C]
    # Batch-invariant under the stand-in (see TODO above): broadcast precomputed.
    vit_cls = jnp.broadcast_to(params["vit_cls_pad"][:, :C], (B, C))
    return vit_cls, sem_cls1, sem_cls_final


# --------------------------------- driver -----------------------------------

if __name__ == "__main__":
    key = jax.random.PRNGKey(0)
    k_x, k_p = jax.random.split(key)
    B = 4   # exercises 2-row head packing (grid=2) and 4 backbone M-tiles
    x = jax.random.normal(k_x, (B, 3, IMG, IMG), jnp.float32)   # NCHW input
    params = init_params(k_p)

    fwd = jax.jit(m3tr_forward)
    vit_cls, sem_cls1, sem_cls_final = fwd(params, x)
    jax.block_until_ready((vit_cls, sem_cls1, sem_cls_final))

    assert vit_cls.shape == (B, NUM_CLASSES)
    assert sem_cls1.shape == (B, NUM_CLASSES)
    assert sem_cls_final.shape == (B, NUM_CLASSES)
    print("KERNEL_OK")
</pallas_src>

<mosaic_0001>
module attributes {stable_mosaic.version = 11 : i64} {
  func.func @_cosine_kernel(%arg0: i32, %arg1: memref<20x768xf32, #tpu.memory_space<vmem>>, %arg2: memref<20x20xf32, #tpu.memory_space<vmem>>) attributes {dimension_semantics = [#tpu.dimension_semantics<arbitrary>], iteration_bounds = array<i64: 1>, scalar_prefetch = 0 : i64, scratch_operands = 0 : i64, tpu.core_type = #tpu.core_type<tc>, window_params = [{pipeline_mode = #tpu.pipeline_mode<synchronous>, transform_indices = @transform_0, window_bounds = array<i64: 20, 768>}, {pipeline_mode = #tpu.pipeline_mode<synchronous>, transform_indices = @transform_1, window_bounds = array<i64: 20, 20>}]} {
    %c0 = arith.constant 0 : index
    %c0_0 = arith.constant 0 : index
    %0 = vector.load %arg1[%c0, %c0_0] : memref<20x768xf32, #tpu.memory_space<vmem>>, vector<20x768xf32>
    %cst = arith.constant dense<0.000000e+00> : vector<20x20xf32>
    %1 = tpu.matmul %0, %0, %cst {dimension_numbers = #tpu.dot_dimension_numbers<[1], [1], [0], [0], [0, 0, 1, 0], [], []>} : vector<20x768xf32>, vector<20x768xf32>, vector<20x20xf32> -> vector<20x20xf32>
    %2 = arith.mulf %0, %0 : vector<20x768xf32>
    %cst_1 = arith.constant dense<0.000000e+00> : vector<20xf32>
    %3 = vector.multi_reduction <add>, %2, %cst_1 [1] : vector<20x768xf32> to vector<20xf32>
    %4 = vector.shape_cast %3 : vector<20xf32> to vector<20x1xf32>
    %5 = math.sqrt %4 : vector<20x1xf32>
    %cst_2 = arith.constant 9.99999993E-9 : f32
    %6 = vector.broadcast %cst_2 : f32 to vector<20x1xf32>
    %7 = arith.maximumf %5, %6 : vector<20x1xf32>
    %cst_3 = arith.constant dense<0.000000e+00> : vector<20x20xf32>
    %8 = tpu.matmul %7, %7, %cst_3 {dimension_numbers = #tpu.dot_dimension_numbers<[1], [1], [0], [0], [0, 0, 1, 0], [], []>} : vector<20x1xf32>, vector<20x1xf32>, vector<20x20xf32> -> vector<20x20xf32>
    %9 = arith.divf %1, %8 : vector<20x20xf32>
    %c0_4 = arith.constant 0 : index
    %c0_5 = arith.constant 0 : index
    %10 = vector.load %arg2[%c0_4, %c0_5] : memref<20x20xf32, #tpu.memory_space<vmem>>, vector<20x20xf32>
    tpu.vector_store %arg2[%c0_4, %c0_5], %9 {strides = array<i32>} : memref<20x20xf32, #tpu.memory_space<vmem>>, vector<20x20xf32>,
    return
  }
  func.func @transform_0(%arg0: i32) -> (i32, i32) {
    %c0_i32 = arith.constant 0 : i32
    %c0_i32_0 = arith.constant 0 : i32
    %c0_i32_1 = arith.constant 0 : i32
    return %c0_i32, %c0_i32_0 : i32, i32
  }
  func.func @transform_1(%arg0: i32) -> (i32, i32) {
    %c0_i32 = arith.constant 0 : i32
    %c0_i32_0 = arith.constant 0 : i32
    %c0_i32_1 = arith.constant 0 : i32
    return %c0_i32, %c0_i32_0 : i32, i32
  }
}

</mosaic_0001>

<bundles_post_ra>
// kernel: tpu_custom_call.1
= control target key start
LH: loop header
LB: loop body
LE: loop exit
PB: predicated region body
PF: predicated region fallthrough
CT: control target
= control target key end

     0   :  { %6 = vsyncpa [#allocation3], 0  ;;  %s659_s0 = inlined_call_operand.hbm [shape: f32[20,768], index: 0, kind: input, shape index: {}]   ;;  %s660_s1 = inlined_call_operand.hbm [shape: f32[20,20], index: 1, kind: output, shape index: {}]  }
   0x1   :  { %7 = vsyncpa [#allocation4], 0  ;;  %s560_s6 = smov [#allocation2]  }
   0x2   :  { %s13_s7 = sshll.u32 %s560_s6, 4  ;;  %s14_s7 = int_to_ptr.vmem [resolvable:$true] %s13_s7 }
   0x3   :  { %s524_s8 = scalar_lea.vmem %s14_s7, 2304  ;;  %p529_p1 = scmp.lt.s32.totalorder %s14_s7, %s14_s7 }
   0x4   :  { %p525_p0 = scmp.ne.s32.totalorder %s14_s7, %s524_s8  ;;  %p530_p2 = scmp.lt.s32.totalorder %s524_s8, %s524_s8 }
   0x6   :  { %p531_p3 = por %p530_p2, %p529_p1 }
   0x8   :  { %p532_p4 = pnand %p531_p3, %p525_p0 }
   0xa   :  { %535 = shalt.err (!%p532_p4)
}
   0xb   :  { %s561_s9 = smov 768   ;;  %s562_s10 = smov 48  }
   0xc   :  { %19 = dma.hbm_to_vmem [thread:$0]  %s659_s0, 2304, %s14_s7, [#allocation3], %s561_s9, %s561_s9, %s562_s10  }
   0xd   :  { %556 = dma.done.wait [#allocation3], 2304  }
   0xe   :  { %557 = vsyncadd [#allocation3], 4294964992  ;;  %v581_v0 = vld [vmem:[#allocation2] sm:$0xff]  ;;  %v24_v1 = vld [vmem:[#allocation2 + $0x8] sm:$0xff]  ;;  %vm313_vm0 = vcmask 1043456   ;;  %v563_v57 = vmov 0.0  }
   0xf   :  { %v583_v2 = vld [vmem:[#allocation2 + $0x10] sm:$0xff]  ;;  %v26_v3 = vld [vmem:[#allocation2 + $0x18] sm:$0xff]  ;;  %v585_v4 = vld [vmem:[#allocation2 + $0x20] sm:$0xff]  ;;  %v281_v6 = vmul.f32 %v581_v0, %v581_v0  ;;  %v282_v7 = vmul.f32 %v24_v1, %v24_v1  ;;  %105 = vmatprep.mubr.f32.mxu0 %v24_v1  ;;  %vm564_vm1 = vmmov 0   ;;  %vm351_vm4 = vcmask 7168   ;;  %s565_s0 = smov [#allocation5]  }
  0x10   :  { %v587_v5 = vld [vmem:[#allocation2 + $0x28] sm:$0xff]  ;;  %v283_v8 = vmul.f32 %v583_v2, %v583_v2  ;;  %v284_v9 = vmul.f32 %v26_v3, %v26_v3  ;;  %v593_v10 = vld [vmem:[#allocation2 + $0x60] sm:$0xf]  ;;  %v597_v12 = vld [vmem:[#allocation2 + $0x70] sm:$0xf]  ;;  %185 = vmatprep.mubr.f32.mxu1 %v26_v3  ;;  %v285_v20 = vmul.f32 %v585_v4, %v585_v4  ;;  %vm447_vm9 = vcmask 162816  }
  0x11   :  { %v595_v11 = vld [vmem:[#allocation2 + $0x68] sm:$0xf]  ;;  %v299_v13 = vadd.f32 %v282_v7, %v281_v6  ;;  %v599_v14 = vld [vmem:[#allocation2 + $0x78] sm:$0xf]  ;;  %v601_v15 = vld [vmem:[#allocation2 + $0x80] sm:$0xf]  ;;  %v293_v17 = vmul.f32 %v593_v10, %v593_v10  ;;  %v295_v19 = vmul.f32 %v597_v12, %v597_v12  ;;  %v286_v31 = vmul.f32 %v587_v5, %v587_v5 }
  0x12   :  { %v603_v16 = vld [vmem:[#allocation2 + $0x88] sm:$0xf]  ;;  %v294_v18 = vmul.f32 %v595_v11, %v595_v11  ;;  %67 = vmatprep.subr.mxu0 %v595_v11  ;;  %v296_v21 = vmul.f32 %v599_v14, %v599_v14  ;;  %v297_v22 = vmul.f32 %v601_v15, %v601_v15  ;;  %v29_v23 = vld [vmem:[#allocation2 + $0x30] sm:$0xff]  ;;  %v30_v24 = vld [vmem:[#allocation2 + $0x38] sm:$0xff]  ;;  %147 = vmatprep.subr.mxu1 %v599_v14  ;;  %s457_s13 = sshll.u32 %s565_s0, 4  ;;  %vm450_vm10 = vcmask 158720   ;;  %s458_s13 = int_to_ptr.vmem [resolvable:$true] %s457_s13 }
  0x13   :  { %v31_v25 = vld [vmem:[#allocation2 + $0x40] sm:$0xff]  ;;  %68 = vmatpush1.xpose.msra.mxu0 %v593_v10  ;;  %v300_v26 = vadd.f32 %v299_v13, %v283_v8  ;;  %v314_v27 = vsel %vm313_vm0, %v293_v17, 0.0  ;;  %v317_v29 = vsel %vm313_vm0, %v295_v19, 0.0  ;;  %v32_v30 = vld [vmem:[#allocation2 + $0x48] sm:$0xff]  ;;  %148 = vmatpush1.xpose.msra.mxu1 %v597_v12  ;;  %v298_v32 = vmul.f32 %v603_v16, %v603_v16  ;;  %v33_v40 = vld [vmem:[#allocation2 + $0x50] sm:$0xff]  ;;  %s536_s14 = scalar_lea.vmem %s458_s13, 384  ;;  %p541_p6 = scmp.lt.s32.totalorder %s458_s13, %s458_s13 }
  0x14   :  { %v315_v28 = vsel %vm313_vm0, %v294_v18, 0.0  ;;  %69 = vmatprep.subr.mxu0 %v30_v24  ;;  %v319_v34 = vsel %vm313_vm0, %v296_v21, 0.0  ;;  %149 = vmatprep.subr.mxu1 %v32_v30  ;;  %v287_v36 = vmul.f32 %v29_v23, %v29_v23  ;;  %v288_v37 = vmul.f32 %v30_v24, %v30_v24  ;;  %v34_v46 = vld [vmem:[#allocation2 + $0x58] sm:$0xff]  ;;  %p537_p5 = scmp.ne.s32.totalorder %s458_s13, %s536_s14  ;;  %p542_p7 = scmp.lt.s32.totalorder %s536_s14, %s536_s14 }
  0x15   :  { %v316_v33 = vadd.f32 %v315_v28, %v314_v27  ;;  %v301_v35 = vadd.f32 %v300_v26, %v284_v9  ;;  %v289_v38 = vmul.f32 %v31_v25, %v31_v25  ;;  %v321_v42 = vsel %vm313_vm0, %v297_v22, 0.0 }
  0x16   :  { %v290_v43 = vmul.f32 %v32_v30, %v32_v30  ;;  %v306_v44 = vadd.f32 %v288_v37, %v287_v36  ;;  %v323_v48 = vsel %vm313_vm0, %v298_v32, 0.0  ;;  %v291_v49 = vmul.f32 %v33_v40, %v33_v40  ;;  %p543_p8 = por %p542_p7, %p541_p6 }
  0x17   :  { %v318_v39 = vadd.f32 %v317_v29, %v316_v33  ;;  %70 = vmatpush1.xpose.msra.mxu0 %v29_v23  ;;  %v302_v41 = vadd.f32 %v301_v35, %v285_v20  ;;  %150 = vmatpush1.xpose.msra.mxu1 %v31_v25  ;;  %v292_v52 = vmul.f32 %v34_v46, %v34_v46 }
  0x18   :  { %71 = vmatprep.subr.mxu0 %v24_v1  ;;  %151 = vmatprep.subr.mxu1 %v26_v3  ;;  %v307_v50 = vadd.f32 %v306_v44, %v289_v38  ;;  %p544_p9 = pnand %p543_p8, %p537_p5 }
  0x19   :  { %v320_v45 = vadd.f32 %v319_v34, %v318_v39  ;;  %v303_v47 = vadd.f32 %v302_v41, %v286_v31 }
  0x1a   :  { %v308_v53 = vadd.f32 %v307_v50, %v290_v43 }
  0x1b   :  { %v322_v51 = vadd.f32 %v321_v42, %v320_v45  ;;  %72 = vmatpush1.xpose.msra.mxu0 %v581_v0  ;;  %304 = vadd.xlane.f32.xlu1 %v303_v47 }
  0x1c   :  { %227 = vmatprep.subr.mxu0 %v603_v16  ;;  %152 = vmatpush1.xpose.msra.mxu1 %v583_v2  ;;  %v309_v55 = vadd.f32 %v308_v53, %v291_v49 }
  0x1d   :  { %v324_v54 = vadd.f32 %v323_v48, %v322_v51  ;;  %481 = vmatprep.subr.mxu1 %v563_v57 }
  0x1e   :  { %106 = vmatmul.mubr.f32.vlgmr.msra.gmra.mxu0 %v581_v0  ;;  %v310_v56 = vadd.f32 %v309_v55, %v292_v52 }
  0x1f   :  { %325 = vadd.xlane.f32.xlu0 %v324_v54  ;;  %228 = vmatpush1.xpose.msra.mxu0 %v601_v15 }
  0x20   :  { %110 = vmatprep.mubr.f32.mxu0 %v30_v24  ;;  %229 = vmatprep.subr.mxu0 %v34_v46 }
  0x21   :  { %186 = vmatmul.mubr.f32.vlgmr.msra.gmra.mxu1 %v583_v2 }
  0x22   :  { %111 = vmatmul.mubr.f32.gmra.mxu0 %v29_v23  ;;  %190 = vmatprep.mubr.f32.mxu1 %v32_v30 }
  0x23   :  { %311 = vadd.xlane.f32.xlu0 %v310_v56  ;;  %230 = vmatpush1.xpose.msra.mxu0 %v33_v40 }
  0x24   :  { %115 = vmatprep.mubr.f32.mxu0 %v595_v11  ;;  %231 = vmatprep.subr.mxu0 %v587_v5 }
  0x25   :  { %191 = vmatmul.mubr.f32.gmra.mxu1 %v31_v25 }
  0x26   :  { %116 = vmatmul.mubr.f32.gmra.mxu0 %v593_v10  ;;  %195 = vmatprep.mubr.f32.mxu1 %v599_v14 }
  0x27   :  { %232 = vmatpush1.xpose.msra.mxu0 %v585_v4  ;;  %265 = vmatprep.mubr.f32.mxu0 %v587_v5 }
  0x29   :  { %196 = vmatmul.mubr.f32.gmra.mxu1 %v597_v12 }
  0x2a   :  { %266 = vmatmul.mubr.f32.vlgmr.msra.gmra.mxu0 %v585_v4  ;;  %487 = vmatprep.mubr.msk.f32.mxu1 %vm564_vm1, %v563_v57 }
  0x2b   :  { %270 = vmatprep.mubr.f32.mxu0 %v34_v46 }
  0x2e   :  { %271 = vmatmul.mubr.f32.gmra.mxu0 %v33_v40 }
  0x2f   :  { %275 = vmatprep.mubr.f32.mxu0 %v603_v16 }
  0x32   :  { %276 = vmatmul.mubr.f32.gmra.mxu0 %v601_v15 }
  0xa4   :  { %v305_v58 = vpop.xlane.xlu1 %304 }
  0xa5   :  { %504 = vrsqrt.f32 %v305_v58  ;;  %vm329_vm5 = vcmp.eq.f32.partialorder %v305_v58, inf  ;;  %v332_v10 = vand.u32 2147483648, %v305_v58  ;;  %vm331_vm8 = vcmp.eq.f32.partialorder %v305_v58, 0.0 }
  0xa8   :  { %v326_v59 = vpop.xlane.xlu0 %325 }
  0xa9   :  { %506 = vrsqrt.f32 %v326_v59  ;;  %vm343_vm2 = vcmp.eq.f32.partialorder %v326_v59, inf  ;;  %v346_v0 = vand.u32 2147483648, %v326_v59  ;;  %vm345_vm3 = vcmp.eq.f32.partialorder %v326_v59, 0.0 }
  0xac   :  { %v312_v60 = vpop.xlane.xlu0 %311 }
  0xad   :  { %508 = vrsqrt.f32 %v312_v60  ;;  %vm336_vm6 = vcmp.eq.f32.partialorder %v312_v60, inf  ;;  %v339_v7 = vand.u32 2147483648, %v312_v60  ;;  %vm338_vm7 = vcmp.eq.f32.partialorder %v312_v60, 0.0 }
  0xb2   :  { %v505_v61 = vpop.eup %504 }
  0xb3   :  { %v328_v1 = vmul.f32 %v505_v61, %v305_v58 }
  0xb5   :  { %v330_v8 = vsel %vm329_vm5, %v305_v58, %v328_v1 }
  0xb6   :  { %v507_v62 = vpop.eup %506  ;;  %v333_v13 = vsel %vm331_vm8, %v332_v10, %v330_v8 }
  0xb7   :  { %v342_v63 = vmul.f32 %v507_v62, %v326_v59  ;;  %v348_v14 = vmax.f32 %v333_v13, 1e-08 }
  0xb9   :  { %v344_v2 = vsel %vm343_vm2, %v326_v59, %v342_v63 }
  0xba   :  { %v509_v3 = vpop.eup %508  ;;  %v347_v4 = vsel %vm345_vm3, %v346_v0, %v344_v2 }
  0xbb   :  { %v335_v5 = vmul.f32 %v509_v3, %v312_v60  ;;  %v350_v6 = vmax.f32 %v347_v4, 1e-08 }
  0xbd   :  { %v337_v9 = vsel %vm336_vm6, %v312_v60, %v335_v5  ;;  %482 = vmatpush3.xpose.msk.msra.mxu1 %vm351_vm4, %v350_v6 }
  0xbe   :  { %v340_v11 = vsel %vm338_vm7, %v339_v7, %v337_v9  ;;  %483 = vmatprep.subr.mxu1 %v563_v57 }
  0xbf   :  { %v349_v12 = vmax.f32 %v340_v11, 1e-08 }
  0xc1   :  { %484 = vmatpush3.xpose.msk.msra.mxu1 %vm351_vm4, %v349_v12 }
  0xc2   :  { %485 = vmatprep.subr.mxu1 %v563_v57 }
  0xc5   :  { %486 = vmatpush3.xpose.msk.msra.mxu1 %vm351_vm4, %v348_v14 }
  0xc8   :  { %488 = vmatmul.mubr.msk.f32.vlgmr.msra.gmra.mxu1 %vm351_vm4, %v348_v14 }
  0xc9   :  { %490 = vmatprep.mubr.msk.f32.mxu1 %vm564_vm1, %v563_v57 }
  0xcc   :  { %491 = vmatmul.mubr.msk.f32.gmra.mxu1 %vm351_vm4, %v349_v12 }
  0xcd   :  { %493 = vmatprep.mubr.msk.f32.mxu1 %vm564_vm1, %v563_v57 }
  0xd0   :  { %494 = vmatmul.mubr.msk.f32.gmra.mxu1 %vm351_vm4, %v350_v6 }
  0xde   :  { %v107_v15 = vpop.f32.mrf.mxu0 }
  0xe0   :  { %v109_v16 = vpop.f32.mrf.mxu0 }
  0xe1   :  { %v187_v17 = vpop.f32.mrf.mxu1 }
  0xe2   :  { %v112_v18 = vpop.f32.mrf.mxu0  ;;  %v188_v19 = vadd.f32 %v187_v17, %v107_v15 }
  0xe3   :  { %v189_v20 = vpop.f32.mrf.mxu1 }
  0xe4   :  { %v114_v21 = vpop.f32.mrf.mxu0 }
  0xe5   :  { %v192_v22 = vpop.f32.mrf.mxu1 }
  0xe6   :  { %v117_v23 = vpop.f32.mrf.mxu0  ;;  %v193_v24 = vadd.f32 %v192_v22, %v112_v18 }
  0xe7   :  { %v194_v25 = vpop.f32.mrf.mxu1 }
  0xe8   :  { %v119_v26 = vpop.f32.mrf.mxu0 }
  0xe9   :  { %v197_v27 = vpop.f32.mrf.mxu1 }
  0xea   :  { %v267_v28 = vpop.f32.mrf.mxu0  ;;  %v198_v29 = vadd.f32 %v197_v27, %v117_v23 }
  0xeb   :  { %v268_v30 = vadd.f32 %v267_v28, %v188_v19  ;;  %v199_v31 = vpop.f32.mrf.mxu1 }
  0xec   :  { %v269_v32 = vpop.f32.mrf.mxu0 }
  0xee   :  { %v272_v33 = vpop.f32.mrf.mxu0 }
  0xef   :  { %v273_v34 = vadd.f32 %v272_v33, %v193_v24 }
  0xf0   :  { %v274_v35 = vpop.f32.mrf.mxu0 }
  0xf2   :  { %v277_v36 = vpop.f32.mrf.mxu0 }
  0xf3   :  { %v278_v37 = vadd.f32 %v277_v36, %v198_v29 }
  0xf4   :  { %v279_v38 = vpop.f32.mrf.mxu0 }
 0x188   :  { %v427_v39 = vpop.f32.mrf.mxu1 }
 0x189   :  { %510 = vrcp.f32 %v427_v39 }
 0x18a   :  { %v489_v40 = vpop.f32.mrf.mxu1 }
 0x18c   :  { %v432_v41 = vpop.f32.mrf.mxu1 }
 0x18d   :  { %512 = vrcp.f32 %v432_v41 }
 0x18e   :  { %v492_v42 = vpop.f32.mrf.mxu1 }
 0x190   :  { %v437_v43 = vpop.f32.mrf.mxu1 }
 0x191   :  { %514 = vrcp.f32 %v437_v43 }
 0x192   :  { %v495_v44 = vpop.f32.mrf.mxu1 }
 0x196   :  { %v511_v45 = vpop.eup %510 }
 0x197   :  { %v442_v46 = vmul.f32 %v511_v45, %v268_v30 }
 0x199   :  { %448 = vst.msk [vmem:[#allocation5] sm:$0xff] %vm447_vm9, %v442_v46 }
 0x19a   :  { %v513_v47 = vpop.eup %512 }
 0x19b   :  { %v444_v48 = vmul.f32 %v513_v47, %v273_v34 }
 0x19d   :  { %449 = vst.msk [vmem:[#allocation5 + $0x8] sm:$0xff] %vm447_vm9, %v444_v48 }
 0x19e   :  { %v515_v49 = vpop.eup %514 }
 0x19f   :  { %v446_v50 = vmul.f32 %v515_v49, %v278_v37 }
 0x1a1   :  { %451 = vst.msk [vmem:[#allocation5 + $0x10] sm:$0xf] %vm450_vm10, %v446_v50 }
 0x1a2   :  { %547 = shalt.err (!%p544_p9)
}
 0x1a3   :  { %s566_s15 = smov 128   ;;  %s567_s16 = smov 8  }
 0x1a4   :  { %463 = dma.vmem_to_hbm [thread:$0]  %s458_s13, 384, %s660_s1, [#allocation4], %s566_s15, %s566_s15, %s567_s16  }
 0x1a5   :  { %558 = dma.done.wait [#allocation4], 384  }
 0x1a6   :  { %559 = vsyncadd [#allocation4], 4294966912 }
 0x1a7   :  { %467 = vsyncpa [#allocation3], 1 }
 0x1a8   :  { %468 = vsyncpa [#allocation4], 1 }

</bundles_post_ra>
